<compile_context>
chip_gen: v6e
topology: v6e:2x2x1
jax: 0.10.0
libtpu: 0.0.40
codegen_flags: <defaults>
</compile_context>

<pallas_src>
import functools

import jax
import jax.numpy as jnp
from jax.experimental import pallas as pl
from jax.experimental.pallas import tpu as pltpu


def _elementwise_terms(x, t, positive_weight, n_real, row_offset, needs_mask):
    """Per-element contributions: (weighted BCE, p*t, p*p + t*t), optionally masked."""
    neg_abs = -jnp.abs(x)
    e = jnp.exp(neg_abs)                       # exp(-|x|), reused below (1 EUP exp / elem)
    softplus = jnp.log1p(e)                    # log(1 + exp(-|x|)) (stable)
    bce = jnp.maximum(x, 0.0) - x * t + softplus
    w = jnp.where(t == 1.0, jnp.float32(positive_weight), jnp.float32(1.0))
    bce_w = bce * w

    r = 1.0 / (1.0 + e)                        # sigmoid(|x|)
    p = jnp.where(x >= 0.0, r, e * r)          # sigmoid(x), reusing e

    if needs_mask:
        rows, lanes = x.shape
        row_ids = jax.lax.broadcasted_iota(jnp.int32, (rows, lanes), 0) + row_offset
        lane_ids = jax.lax.broadcasted_iota(jnp.int32, (rows, lanes), 1)
        mask = (row_ids * lanes + lane_ids) < n_real
        zero = jnp.float32(0.0)
        bce_w = jnp.where(mask, bce_w, zero)
        p = jnp.where(mask, p, zero)
        t = jnp.where(mask, t, zero)

    pt = p * t
    ppt = p * p + t * t
    return bce_w, pt, ppt


# ----------------------------------------------------------------------------
# Small-input fast path: one block, scalar loss written to SMEM.
# ----------------------------------------------------------------------------
def _seg_loss_small_kernel(x_ref, t_ref, out_ref, *, positive_weight, gamma, smooth,
                           n_real, needs_mask):
    x = x_ref[...].astype(jnp.float32)
    t = t_ref[...].astype(jnp.float32)
    bce_w, pt, ppt = _elementwise_terms(x, t, positive_weight, n_real, 0, needs_mask)

    bce_mean = jnp.sum(bce_w) / jnp.float32(n_real)
    num = jnp.sum(pt) + jnp.float32(smooth)
    den = jnp.sum(ppt) + jnp.float32(smooth)
    dice = 1.0 - num / den
    out_ref[0, 0] = jnp.float32(gamma) * bce_mean + jnp.float32(1.0 - gamma) * dice


# ----------------------------------------------------------------------------
# Tiled / pipelined path: grid = (num_cores [parallel], tiles_per_core [arbitrary]).
# Per-core partial sums are emitted as (8,128) blocks; wrapper does the tiny final combine.
# ----------------------------------------------------------------------------
def _seg_loss_tiled_kernel(x_ref, t_ref, bce_out, pt_out, ppt_out,
                           bce_acc, pt_acc, ppt_acc, *,
                           positive_weight, n_real, tile_rows, tiles_per_core, needs_mask):
    c = pl.program_id(0)
    r = pl.program_id(1)

    @pl.when(r == 0)
    def _():
        bce_acc[...] = jnp.zeros_like(bce_acc)
        pt_acc[...] = jnp.zeros_like(pt_acc)
        ppt_acc[...] = jnp.zeros_like(ppt_acc)

    x = x_ref[...].astype(jnp.float32)
    t = t_ref[...].astype(jnp.float32)
    row_offset = (c * tiles_per_core + r) * tile_rows
    bce_w, pt, ppt = _elementwise_terms(x, t, positive_weight, n_real, row_offset, needs_mask)

    # Fold rows with pure vreg adds (VALU); defer the XLU cross-lane reduce to the wrapper.
    def fold(a):
        return jnp.sum(a.reshape(tile_rows // 8, 8, 128), axis=0)

    bce_acc[...] += fold(bce_w)
    pt_acc[...] += fold(pt)
    ppt_acc[...] += fold(ppt)

    @pl.when(r == pl.num_programs(1) - 1)
    def _():
        bce_out[...] = bce_acc[...]
        pt_out[...] = pt_acc[...]
        ppt_out[...] = ppt_acc[...]


# ----------------------------------------------------------------------------
# Wrapper
# ----------------------------------------------------------------------------
def protein_seg_loss(predict, target, *, positive_weight=5.0, gamma=0.5, smooth=1.0,
                     tile_rows=2048, num_cores=2):
    """predict, target: [N, 1] (or any shape) logits / binary targets, any dtype."""
    assert 0.0 <= gamma <= 1.0, f"invalid gamma {gamma}"
    assert tile_rows % 32 == 0, "tile_rows must be a multiple of 32 (int8/bf16 sublane tiling)"
    n = predict.size
    assert target.size == n, "predict & target size mismatch"

    x = predict.reshape(-1)
    t = target.reshape(-1)
    rows = -(-n // 128)

    # ---------------- small / single-block fast path ----------------
    if rows <= tile_rows:
        padded_n = rows * 128
        needs_mask = padded_n != n
        if needs_mask:
            x = jnp.pad(x, (0, padded_n - n))
            t = jnp.pad(t, (0, padded_n - n))
        x2 = x.reshape(rows, 128)
        t2 = t.reshape(rows, 128)
        kernel = functools.partial(
            _seg_loss_small_kernel,
            positive_weight=float(positive_weight), gamma=float(gamma),
            smooth=float(smooth), n_real=n, needs_mask=needs_mask)
        out = pl.pallas_call(
            kernel,
            out_shape=jax.ShapeDtypeStruct((1, 1), jnp.float32),
            in_specs=[
                pl.BlockSpec(memory_space=pltpu.MemorySpace.VMEM),
                pl.BlockSpec(memory_space=pltpu.MemorySpace.VMEM),
            ],
            out_specs=pl.BlockSpec(memory_space=pltpu.MemorySpace.SMEM),
        )(x2, t2)
        return out[0, 0]

    # ---------------- tiled / pipelined path ----------------
    chunk = tile_rows * num_cores
    padded_rows = -(-rows // chunk) * chunk
    tiles_per_core = padded_rows // chunk
    padded_n = padded_rows * 128
    needs_mask = padded_n != n
    if needs_mask:
        x = jnp.pad(x, (0, padded_n - n))
        t = jnp.pad(t, (0, padded_n - n))
    x2 = x.reshape(padded_rows, 128)
    t2 = t.reshape(padded_rows, 128)

    kernel = functools.partial(
        _seg_loss_tiled_kernel,
        positive_weight=float(positive_weight), n_real=n, tile_rows=tile_rows,
        tiles_per_core=tiles_per_core, needs_mask=needs_mask)

    in_spec = pl.BlockSpec((tile_rows, 128), lambda c, r: (c * tiles_per_core + r, 0))
    out_spec = pl.BlockSpec((8, 128), lambda c, r: (c, 0))

    # Default tile (2048,128) f32: 1 MiB/block, 2 inputs x 2 pipeline buffers = 4 MiB,
    # comfortably inside the scoped-VMEM default on v5e/v6e/v7x — no vmem_limit override needed.
    bce_part, pt_part, ppt_part = pl.pallas_call(
        kernel,
        out_shape=(
            jax.ShapeDtypeStruct((num_cores * 8, 128), jnp.float32),
            jax.ShapeDtypeStruct((num_cores * 8, 128), jnp.float32),
            jax.ShapeDtypeStruct((num_cores * 8, 128), jnp.float32),
        ),
        grid=(num_cores, tiles_per_core),
        in_specs=[in_spec, in_spec],
        out_specs=[out_spec, out_spec, out_spec],
        scratch_shapes=[pltpu.VMEM((8, 128), jnp.float32) for _ in range(3)],
        compiler_params=pltpu.CompilerParams(
            dimension_semantics=("parallel", "arbitrary")),
    )(x2, t2)

    # Tiny final combine on per-core partials (negligible XLA work).
    sum_bce = jnp.sum(bce_part)
    sum_pt = jnp.sum(pt_part)
    sum_ppt = jnp.sum(ppt_part)
    bce_mean = sum_bce / jnp.float32(n)
    dice = 1.0 - (sum_pt + jnp.float32(smooth)) / (sum_ppt + jnp.float32(smooth))
    return jnp.float32(gamma) * bce_mean + jnp.float32(1.0 - gamma) * dice


# ----------------------------------------------------------------------------
# Pure-JAX reference (mirrors the PyTorch module)
# ----------------------------------------------------------------------------
def _reference_loss(predict, target, positive_weight=5.0, gamma=0.5, smooth=1.0):
    x = predict.astype(jnp.float32)
    t = target.astype(jnp.float32)
    bce = jnp.maximum(x, 0.0) - x * t + jnp.log1p(jnp.exp(-jnp.abs(x)))
    w = jnp.where(t == 1.0, positive_weight, 1.0)
    bce_mean = jnp.mean(bce * w)
    p = jax.nn.sigmoid(x)
    num = jnp.sum(p * t) + smooth
    den = jnp.sum(p * p + t * t) + smooth
    dice = 1.0 - num / den
    return gamma * bce_mean + (1.0 - gamma) * dice


if __name__ == "__main__":
    key = jax.random.PRNGKey(0)
    k1, k2, k3, k4 = jax.random.split(key, 4)

    # --- Test 1: small [N, 1] problem (single-block fast path), f32 inputs ---
    N1 = 256
    predict1 = jax.random.normal(k1, (N1, 1), dtype=jnp.float32)
    target1 = jax.random.bernoulli(k2, p=0.2, shape=(N1, 1)).astype(jnp.float32)
    loss1 = jax.block_until_ready(protein_seg_loss(predict1, target1))
    ref1 = _reference_loss(predict1, target1)
    assert jnp.allclose(loss1, ref1, rtol=1e-5, atol=1e-5), (loss1, ref1)

    # --- Test 2: non-multiple-of-128 N, narrow dtypes, tiled/pipelined 2-core path ---
    N2 = 33000
    predict2 = jax.random.normal(k3, (N2, 1), dtype=jnp.bfloat16)
    target2 = jax.random.bernoulli(k4, p=0.2, shape=(N2, 1)).astype(jnp.int8)
    loss2 = jax.block_until_ready(
        protein_seg_loss(predict2, target2, tile_rows=64, num_cores=2))
    ref2 = _reference_loss(predict2.astype(jnp.float32), target2.astype(jnp.float32))
    assert jnp.allclose(loss2, ref2, rtol=1e-4, atol=1e-5), (loss2, ref2)

    print("KERNEL_OK")
</pallas_src>

<mosaic_0001>
module attributes {stable_mosaic.version = 11 : i64} {
  func.func @_seg_loss_small_kernel(%arg0: memref<2x128xf32, #tpu.memory_space<vmem>>, %arg1: memref<2x128xf32, #tpu.memory_space<vmem>>, %arg2: memref<1x1xf32, #tpu.memory_space<smem>>) attributes {dimension_semantics = [], scalar_prefetch = 0 : i64, scratch_operands = 0 : i64, tpu.core_type = #tpu.core_type<tc>} {
    %c0 = arith.constant 0 : index
    %c0_0 = arith.constant 0 : index
    %0 = vector.load %arg0[%c0, %c0_0] : memref<2x128xf32, #tpu.memory_space<vmem>>, vector<2x128xf32>
    %c0_1 = arith.constant 0 : index
    %c0_2 = arith.constant 0 : index
    %1 = vector.load %arg1[%c0_1, %c0_2] : memref<2x128xf32, #tpu.memory_space<vmem>>, vector<2x128xf32>
    %2 = math.absf %0 : vector<2x128xf32>
    %cst = arith.constant 0.000000e+00 : f32
    %3 = vector.broadcast %cst : f32 to vector<2x128xf32>
    %4 = arith.subf %3, %2 : vector<2x128xf32>
    %5 = math.exp %4 : vector<2x128xf32>
    %6 = math.log1p %5 : vector<2x128xf32>
    %cst_3 = arith.constant 0.000000e+00 : f32
    %7 = vector.broadcast %cst_3 : f32 to vector<2x128xf32>
    %8 = arith.maximumf %0, %7 : vector<2x128xf32>
    %9 = arith.mulf %0, %1 : vector<2x128xf32>
    %10 = arith.subf %8, %9 : vector<2x128xf32>
    %11 = arith.addf %10, %6 : vector<2x128xf32>
    %cst_4 = arith.constant 1.000000e+00 : f32
    %12 = vector.broadcast %cst_4 : f32 to vector<2x128xf32>
    %13 = arith.cmpf oeq, %1, %12 : vector<2x128xf32>
    %cst_5 = arith.constant 5.000000e+00 : f32
    %cst_6 = arith.constant 1.000000e+00 : f32
    %14 = vector.broadcast %cst_5 : f32 to vector<2x128xf32>
    %15 = vector.broadcast %cst_6 : f32 to vector<2x128xf32>
    %16 = arith.select %13, %14, %15 : vector<2x128xi1>, vector<2x128xf32>
    %17 = arith.mulf %11, %16 : vector<2x128xf32>
    %cst_7 = arith.constant 1.000000e+00 : f32
    %18 = vector.broadcast %cst_7 : f32 to vector<2x128xf32>
    %19 = arith.addf %18, %5 : vector<2x128xf32>
    %cst_8 = arith.constant 1.000000e+00 : f32
    %20 = vector.broadcast %cst_8 : f32 to vector<2x128xf32>
    %21 = arith.divf %20, %19 : vector<2x128xf32>
    %cst_9 = arith.constant 0.000000e+00 : f32
    %22 = vector.broadcast %cst_9 : f32 to vector<2x128xf32>
    %23 = arith.cmpf oge, %0, %22 : vector<2x128xf32>
    %24 = arith.mulf %5, %21 : vector<2x128xf32>
    %25 = arith.select %23, %21, %24 : vector<2x128xi1>, vector<2x128xf32>
    %26 = arith.mulf %25, %1 : vector<2x128xf32>
    %27 = arith.mulf %25, %25 : vector<2x128xf32>
    %28 = arith.mulf %1, %1 : vector<2x128xf32>
    %29 = arith.addf %27, %28 : vector<2x128xf32>
    %30 = vector.shape_cast %17 : vector<2x128xf32> to vector<1x2x128xf32>
    %cst_10 = arith.constant dense<0.000000e+00> : vector<1xf32>
    %31 = vector.multi_reduction <add>, %30, %cst_10 [1, 2] : vector<1x2x128xf32> to vector<1xf32>
    %32 = vector.shape_cast %31 : vector<1xf32> to vector<1x1x1xf32>
    %33 = vector.extract %32[0, 0, 0] : f32 from vector<1x1x1xf32>
    %cst_11 = arith.constant 2.560000e+02 : f32
    %34 = arith.divf %33, %cst_11 : f32
    %35 = vector.shape_cast %26 : vector<2x128xf32> to vector<1x2x128xf32>
    %cst_12 = arith.constant dense<0.000000e+00> : vector<1xf32>
    %36 = vector.multi_reduction <add>, %35, %cst_12 [1, 2] : vector<1x2x128xf32> to vector<1xf32>
    %37 = vector.shape_cast %36 : vector<1xf32> to vector<1x1x1xf32>
    %38 = vector.extract %37[0, 0, 0] : f32 from vector<1x1x1xf32>
    %cst_13 = arith.constant 1.000000e+00 : f32
    %39 = arith.addf %38, %cst_13 : f32
    %40 = vector.shape_cast %29 : vector<2x128xf32> to vector<1x2x128xf32>
    %cst_14 = arith.constant dense<0.000000e+00> : vector<1xf32>
    %41 = vector.multi_reduction <add>, %40, %cst_14 [1, 2] : vector<1x2x128xf32> to vector<1xf32>
    %42 = vector.shape_cast %41 : vector<1xf32> to vector<1x1x1xf32>
    %43 = vector.extract %42[0, 0, 0] : f32 from vector<1x1x1xf32>
    %cst_15 = arith.constant 1.000000e+00 : f32
    %44 = arith.addf %43, %cst_15 : f32
    %45 = arith.divf %39, %44 : f32
    %cst_16 = arith.constant 1.000000e+00 : f32
    %46 = arith.subf %cst_16, %45 : f32
    %cst_17 = arith.constant 5.000000e-01 : f32
    %47 = arith.mulf %cst_17, %34 : f32
    %cst_18 = arith.constant 5.000000e-01 : f32
    %48 = arith.mulf %cst_18, %46 : f32
    %49 = arith.addf %47, %48 : f32
    %c0_19 = arith.constant 0 : index
    %c0_20 = arith.constant 0 : index
    %50 = memref.load %arg2[%c0_19, %c0_20] : memref<1x1xf32, #tpu.memory_space<smem>>
    memref.store %49, %arg2[%c0_19, %c0_20] : memref<1x1xf32, #tpu.memory_space<smem>>
    return
  }
}

</mosaic_0001>

<bundles_post_ra>
// kernel: tpu_custom_call.1
= control target key start
LH: loop header
LB: loop body
LE: loop exit
PB: predicated region body
PF: predicated region fallthrough
CT: control target
= control target key end

     0   :  { %7 = vsyncpa [#allocation3], 0  ;;  %s231_s0 = inlined_call_operand.hbm [shape: f32[2,128], index: 0, kind: input, shape index: {}]   ;;  %s232_s1 = inlined_call_operand.hbm [shape: f32[2,128], index: 1, kind: input, shape index: {}]   ;;  %s233_s2 = inlined_call_operand.hbm [shape: f32[1,1], index: 2, kind: output, shape index: {}]  }
   0x1   :  { %8 = vsyncpa [#allocation6], 0 }
   0x2   :  { %9 = vsyncpa [#allocation4], 0  ;;  %s203_s9 = smov [#allocation2]   ;;  %s204_s11 = smov [#allocation5]  }
   0x3   :  { %s16_s10 = sshll.u32 %s203_s9, 4  ;;  %s26_s12 = sshll.u32 %s204_s11, 4  ;;  %s17_s10 = int_to_ptr.vmem [resolvable:$true] %s16_s10  ;;  %s27_s12 = int_to_ptr.vmem [resolvable:$true] %s26_s12 }
   0x4   :  { %s157_s13 = scalar_lea.vmem %s17_s10, 32  ;;  %p162_p1 = scmp.lt.s32.totalorder %s17_s10, %s17_s10 }
   0x5   :  { %p158_p0 = scmp.ne.s32.totalorder %s17_s10, %s157_s13  ;;  %p163_p2 = scmp.lt.s32.totalorder %s157_s13, %s157_s13 }
   0x7   :  { %p164_p3 = por %p163_p2, %p162_p1 }
   0x9   :  { %p165_p4 = pnand %p164_p3, %p158_p0 }
   0xb   :  { %168 = shalt.err (!%p165_p4)
}
   0xc   :  { %19 = dma.hbm_to_vmem [thread:$0]  %s231_s0, 32, %s17_s10, [#allocation3]  }
   0xd   :  { %s177_s16 = scalar_lea.vmem %s27_s12, 32  ;;  %p182_p6 = scmp.lt.s32.totalorder %s27_s12, %s27_s12 }
   0xe   :  { %p178_p5 = scmp.ne.s32.totalorder %s27_s12, %s177_s16  ;;  %p183_p7 = scmp.lt.s32.totalorder %s177_s16, %s177_s16 }
  0x10   :  { %p184_p8 = por %p183_p7, %p182_p6 }
  0x12   :  { %p185_p9 = pnand %p184_p8, %p178_p5 }
  0x14   :  { %188 = shalt.err (!%p185_p9)
}
  0x15   :  { %29 = dma.hbm_to_vmem [thread:$0]  %s232_s1, 32, %s27_s12, [#allocation6]  }
  0x16   :  { %197 = dma.done.wait [#allocation3], 32  }
  0x17   :  { %198 = vsyncadd [#allocation3], 4294967264 }
  0x18   :  { %199 = dma.done.wait [#allocation6], 32  }
  0x19   :  { %200 = vsyncadd [#allocation6], 4294967264  ;;  %v36_v0 = vld [vmem:[#allocation2] sm:$0x3]  ;;  %v37_v7 = vld [vmem:[#allocation5] sm:$0x3] }
  0x1a   :  { %v38_v1 = vand.u32 2147483647, %v36_v0  ;;  %v51_v10 = vmax.f32 %v36_v0, 0.0  ;;  %v52_v11 = vmul.f32 %v37_v7, %v36_v0  ;;  %vm61_vm0 = vcmp.ge.f32.partialorder %v36_v0, 0.0  ;;  %s206_s29 = smov [#allocation7]  }
  0x1b   :  { %vm55_vm2 = vcmp.eq.f32.partialorder %v37_v7, 1.0  ;;  %v66_v17 = vmul.f32 %v37_v7, %v37_v7  ;;  %v205_v22 = vmov 1.0   ;;  %vm68_vm3 = vcmask 1041408  }
  0x1c   :  { %v39_v2 = vsub.f32 0.0, %v38_v1  ;;  %v53_v16 = vsub.f32 %v51_v10, %v52_v11  ;;  %v56_v23 = vsel %vm55_vm2, 5.0, %v205_v22 }
  0x1e   :  { %v40_v3 = vmul.f32 1.442695, %v39_v2 }
  0x20   :  { %141 = vpow2.f32 %v40_v3 }
  0x2d   :  { %v142_v4 = vpop.eup %141 }
  0x2e   :  { %v42_v5 = vadd.f32 1.0, %v142_v4  ;;  %v45_v6 = vmul.f32 -0.5, %v142_v4  ;;  %v48_v9 = vand.u32 2147483647, %v142_v4 }
  0x30   :  { %143 = vrcp.f32 %v42_v5  ;;  %v46_v8 = vadd.f32 1.0, %v45_v6  ;;  %vm49_vm1 = vcmp.lt.f32.partialorder %v48_v9, 0.0004427343 }
  0x31   :  { %145 = vlog2.f32 %v42_v5 }
  0x32   :  { %v47_v13 = vmul.f32 %v142_v4, %v46_v8 }
  0x3d   :  { %v144_v12 = vpop.eup %143 }
  0x3e   :  { %v146_v14 = vpop.eup %145  ;;  %v62_v15 = vmul.f32 %v144_v12, %v142_v4 }
  0x3f   :  { %v44_v18 = vmul.f32 0.6931472, %v146_v14 }
  0x40   :  { %v63_v19 = vsel %vm61_vm0, %v144_v12, %v62_v15 }
  0x41   :  { %v65_v20 = vmul.f32 %v63_v19, %v63_v19  ;;  %v50_v21 = vsel %vm49_vm1, %v47_v13, %v44_v18  ;;  %v64_v27 = vmul.f32 %v63_v19, %v37_v7 }
  0x42   :  { %v54_v24 = vadd.f32 %v53_v16, %v50_v21 }
  0x43   :  { %v67_v25 = vadd.f32 %v66_v17, %v65_v20  ;;  %v82_v30 = vsel %vm68_vm3, %v64_v27, 0.0 }
  0x44   :  { %v57_v26 = vmul.f32 %v56_v23, %v54_v24 }
  0x45   :  { %v93_v28 = vsel %vm68_vm3, %v67_v25, 0.0 }
  0x46   :  { %94 = vadd.xlane.f32.xlu1 %v93_v28  ;;  %v69_v29 = vsel %vm68_vm3, %v57_v26, 0.0 }
  0x47   :  { %70 = vadd.xlane.f32.xlu0 %v69_v29 }
  0x4b   :  { %83 = vadd.xlane.f32.xlu0 %v82_v30 }
  0xcf   :  { %v95_v31 = vpop.xlane.xlu1 %94 }
  0xd0   :  { %v96_v32 = vrot.slane %v95_v31, 4  ;;  %v71_v33 = vpop.xlane.xlu0 %70 }
  0xd1   :  { %v72_v34 = vrot.slane %v71_v33, 4 }
  0xd2   :  { %v97_v35 = vadd.f32 %v96_v32, %v95_v31 }
  0xd3   :  { %v73_v36 = vadd.f32 %v72_v34, %v71_v33 }
  0xd4   :  { %v98_v37 = vrot.slane %v97_v35, 2  ;;  %v84_v38 = vpop.xlane.xlu0 %83 }
  0xd5   :  { %v74_v39 = vrot.slane %v73_v36, 2  ;;  %v85_v40 = vrot.slane %v84_v38, 4 }
  0xd6   :  { %v99_v43 = vadd.f32 %v98_v37, %v97_v35 }
  0xd7   :  { %v86_v41 = vadd.f32 %v85_v40, %v84_v38  ;;  %v75_v42 = vadd.f32 %v74_v39, %v73_v36 }
  0xd8   :  { %v100_v48 = vrot.slane %v99_v43, 1 }
  0xd9   :  { %v87_v44 = vrot.slane %v86_v41, 2  ;;  %v76_v45 = vrot.slane %v75_v42, 1 }
  0xda   :  { %v101_v51 = vadd.f32 %v100_v48, %v99_v43 }
  0xdb   :  { %v88_v46 = vadd.f32 %v87_v44, %v86_v41  ;;  %v77_v47 = vadd.f32 %v76_v45, %v75_v42 }
  0xdd   :  { %129 = vpush %v77_v47  ;;  %v89_v49 = vrot.slane %v88_v46, 1 }
  0xdf   :  { %v90_v50 = vadd.f32 %v89_v49, %v88_v46 }
  0xe1   :  { %131 = vpush %v90_v50 }
  0xe2   :  { %133 = vpush %v101_v51 }
 0x10e   :  { %s130_s0 = spop %129 }
 0x10f   :  { %s81_s22 = smul.f32 0.00390625, %s130_s0 }
 0x111   :  { %s109_s26 = smul.f32 0.5, %s81_s22 }
 0x112   :  { %s132_s1 = spop %131 }
 0x113   :  { %s134_s19 = spop %133  ;;  %s92_s21 = sadd.f32 1.0, %s132_s1 }
 0x114   :  { %s103_s20 = sadd.f32 1.0, %s134_s19 }
 0x116   :  { %v104_v52 = vstv %s103_s20 }
 0x117   :  { %147 = vrcp.f32 %v104_v52 }
 0x124   :  { %v148_v53 = vpop.eup %147 }
 0x125   :  { %135 = vpush %v148_v53 }
 0x156   :  { %s136_s23 = spop %135 }
 0x157   :  { %s107_s24 = smul.f32 %s136_s23, %s92_s21 }
 0x159   :  { %s108_s25 = ssub.f32 1.0, %s107_s24 }
 0x15b   :  { %s110_s27 = smul.f32 0.5, %s108_s25 }
 0x15d   :  { %s111_s28 = sadd.f32 %s110_s27, %s109_s26 }
 0x15f   :  { %113 = sst [smem:[#allocation7]] %s111_s28 }
 0x160   :  { %121 = dma.smem_to_hbm %s206_s29, 16, %s233_s2, [#allocation4]  }
 0x161   :  { %201 = dma.done.wait [#allocation4], 16  }
 0x162   :  { %202 = vsyncadd [#allocation4], 4294967280 }
 0x163   :  { %125 = sfence }
 0x164   :  { %126 = vsyncpa [#allocation3], 1 }
 0x165   :  { %127 = vsyncpa [#allocation6], 1 }
 0x166   :  { %128 = vsyncpa [#allocation4], 1 }

</bundles_post_ra>
